<compile_context>
chip_gen: v5e
topology: v5e:2x2
jax: 0.10.0
libtpu: 0.0.40
codegen_flags: <defaults>
</compile_context>

<pallas_src>
import functools

import jax
import jax.numpy as jnp
from jax.experimental import pallas as pl
from jax.experimental.pallas import tpu as pltpu


def _round_up(x, m):
    return ((x + m - 1) // m) * m


# --------------------------------------------------------------------------- #
# Kernel
# --------------------------------------------------------------------------- #
def _swiglu_kernel(x_ref, w12_ref, w3_ref, o_ref, acc_ref, *, tf):
    # x_ref  : (tm, d_model)      token tile (resident across k)
    # w12_ref: (d_model, 2*tf)    packed [w1 tile_k | w2 tile_k]  (streamed)
    # w3_ref : (tf, d_model)      tile_k of the down projection   (streamed)
    # o_ref  : (tm, d_model)      output tile (resident across k)
    # acc_ref: (tm, d_model) f32  accumulator scratch
    k = pl.program_id(1)

    @pl.when(k == 0)
    def _():
        acc_ref[...] = jnp.zeros_like(acc_ref)

    # One MXU matmul produces both up-projections (w1 | w2 packed side by side).
    h = jnp.dot(x_ref[...], w12_ref[...], preferred_element_type=jnp.float32)
    h1 = h[:, :tf]
    h2 = h[:, tf:]
    # SiLU(h1) * h2 in f32 (sigmoid -> EUP, muls -> VPU).
    gated = (h1 * jax.nn.sigmoid(h1)) * h2

    acc_ref[...] += jnp.dot(gated.astype(w3_ref.dtype), w3_ref[...],
                            preferred_element_type=jnp.float32)

    @pl.when(k == pl.num_programs(1) - 1)
    def _():
        o_ref[...] = acc_ref[...].astype(o_ref.dtype)


# --------------------------------------------------------------------------- #
# Tile planning (per-generation VMEM budget)
# --------------------------------------------------------------------------- #
def _vmem_budget_bytes():
    """Returns (usable VMEM budget in bytes, is_small_vmem_chip)."""
    cap = None
    try:
        info = pltpu.get_tpu_info()
        cap = getattr(info, "vmem_capacity_bytes", None)
    except Exception:
        cap = None
    if cap is None:
        cap = 64 * 2 ** 20          # conservative if undetectable
    if cap <= 64 * 2 ** 20:         # v7x-class: 64 MiB physical per TC, 2 TCs
        return 52 * 2 ** 20, True
    return 104 * 2 ** 20, False     # v5e/v6e: 128 MiB physical, 1 TC


def plan_swiglu_tiles(tokens, d_model, d_ff, x_dtype, w_dtype, tm=None, tf=None):
    """Pick (tm, tf, vmem_limit_bytes) that fit the chip's VMEM budget."""
    budget, two_cores = _vmem_budget_bytes()
    xb = jnp.dtype(x_dtype).itemsize
    wb = jnp.dtype(w_dtype).itemsize

    tm_eff = tm if tm is not None else (512 if two_cores else 1024)
    tf_eff = tf if tf is not None else 512
    tm_eff = max(8, _round_up(tm_eff, 8))
    tf_eff = max(128, _round_up(tf_eff, 128))
    tm_eff = min(tm_eff, _round_up(tokens, 8))
    tf_eff = min(tf_eff, _round_up(d_ff, 128))

    # Megacore (2 TCs): ensure the "parallel" token axis has >= 2 tiles.
    if (two_cores and tm is None and tokens >= 16
            and _round_up(tokens, tm_eff) // tm_eff < 2):
        tm_eff = min(tm_eff, _round_up(pl.cdiv(tokens, 2), 8))

    def _needed(tm_, tf_):
        w_stream = (d_model * 2 * tf_ + tf_ * d_model) * wb          # w12 + w3 tiles
        x_out = tm_ * d_model * 2 * xb                               # x + out tiles
        acc = tm_ * d_model * 4                                      # f32 scratch
        inter = tm_ * 2 * tf_ * 4 + tm_ * tf_ * 4 + tm_ * tf_ * wb   # h, gated, cast
        return 2 * w_stream + 2 * x_out + acc + inter

    # Shrink to fit, alternating: tf down to 256, then tm down to 256, then the rest.
    while _needed(tm_eff, tf_eff) > budget and (tf_eff > 128 or tm_eff > 8):
        if tf_eff > 256:
            tf_eff -= 128
        elif tm_eff > 256:
            tm_eff = max(8, _round_up(tm_eff // 2, 8))
        elif tf_eff > 128:
            tf_eff -= 128
        else:
            tm_eff = max(8, _round_up(tm_eff // 2, 8))

    vmem_limit = int(min(budget, max(_needed(tm_eff, tf_eff) + (4 << 20), 32 << 20)))
    return tm_eff, tf_eff, vmem_limit


# --------------------------------------------------------------------------- #
# Weight packing (do ONCE at weight-load time, not per forward call)
# --------------------------------------------------------------------------- #
def pack_swiglu_weights(w1, w2, w3, tf):
    """Pad d_ff to a multiple of tf and pack w1|w2 as (n_kt, d_model, 2*tf).

    Each k block of the packed tensor is one contiguous HBM slab, so the
    per-step weight DMA is a single large contiguous transfer.
    """
    d_model, d_ff = w1.shape
    d_ff_p = _round_up(d_ff, tf)
    pad = d_ff_p - d_ff
    w1p = w1 if pad == 0 else jnp.pad(w1, ((0, 0), (0, pad)))
    w2p = w2 if pad == 0 else jnp.pad(w2, ((0, 0), (0, pad)))
    w3p = w3 if pad == 0 else jnp.pad(w3, ((0, pad), (0, 0)))
    n_kt = d_ff_p // tf
    w1r = w1p.reshape(d_model, n_kt, tf).transpose(1, 0, 2)   # (n_kt, d_model, tf)
    w2r = w2p.reshape(d_model, n_kt, tf).transpose(1, 0, 2)
    w12 = jnp.concatenate([w1r, w2r], axis=2)                 # (n_kt, d_model, 2*tf)
    return w12, w3p


# --------------------------------------------------------------------------- #
# pallas_call wrapper (pre-packed weights)
# --------------------------------------------------------------------------- #
@functools.partial(jax.jit, static_argnames=("tm", "tf", "vmem_limit"))
def swiglu_pallas_packed(x, w12, w3p, *, tm, tf, vmem_limit):
    """x: [tokens, d_model]; w12: [n_kt, d_model, 2*tf]; w3p: [n_kt*tf, d_model]."""
    tokens, d_model = x.shape
    n_kt = w12.shape[0]
    assert w12.shape[2] == 2 * tf and w3p.shape[0] == n_kt * tf
    d_ff_p = n_kt * tf

    tokens_p = _round_up(tokens, tm)
    n_mt = tokens_p // tm
    xp = x if tokens_p == tokens else jnp.pad(x, ((0, tokens_p - tokens), (0, 0)))

    xb = jnp.dtype(x.dtype).itemsize
    wb = jnp.dtype(w12.dtype).itemsize
    cost = pl.CostEstimate(
        flops=6 * tokens_p * d_model * d_ff_p,
        transcendentals=tokens_p * d_ff_p,
        bytes_accessed=(tokens_p * d_model * 2 * xb          # x read + out write
                        + n_mt * 3 * d_model * d_ff_p * wb), # weights re-streamed n_mt times
    )

    kernel = functools.partial(_swiglu_kernel, tf=tf)

    # TODO(synk): if a profile shows exposed DMA at k==0 of each token tile,
    # add pipeline_mode=pl.Buffered(3) to the weight specs (v5e/v6e headroom only).
    out_p = pl.pallas_call(
        kernel,
        out_shape=jax.ShapeDtypeStruct((tokens_p, d_model), x.dtype),
        grid_spec=pltpu.PrefetchScalarGridSpec(
            num_scalar_prefetch=0,
            grid=(n_mt, n_kt),
            in_specs=[
                pl.BlockSpec((tm, d_model), lambda i, k: (i, 0)),            # x
                pl.BlockSpec((None, d_model, 2 * tf), lambda i, k: (k, 0, 0)),  # w1|w2 (contiguous slab)
                pl.BlockSpec((tf, d_model), lambda i, k: (k, 0)),            # w3
            ],
            out_specs=pl.BlockSpec((tm, d_model), lambda i, k: (i, 0)),
            scratch_shapes=[pltpu.VMEM((tm, d_model), jnp.float32)],
        ),
        compiler_params=pltpu.CompilerParams(
            dimension_semantics=("parallel", "arbitrary"),
            vmem_limit_bytes=vmem_limit,
        ),
        cost_estimate=cost,
    )(xp, w12, w3p)

    return out_p[:tokens] if tokens_p != tokens else out_p


def swiglu_pallas(x, w1, w2, w3, *, tm=None, tf=None):
    """One-shot convenience wrapper (packs weights per call).

    For static weights, prefer: plan_swiglu_tiles(...) once, pack_swiglu_weights(...)
    once, then swiglu_pallas_packed(...) per forward call.
    """
    tokens, d_model = x.shape
    d_ff = w1.shape[1]
    tm_e, tf_e, vmem_limit = plan_swiglu_tiles(
        tokens, d_model, d_ff, x.dtype, w1.dtype, tm=tm, tf=tf)
    w12, w3p = pack_swiglu_weights(w1, w2, w3, tf_e)
    return swiglu_pallas_packed(x, w12, w3p, tm=tm_e, tf=tf_e, vmem_limit=vmem_limit)


def swiglu_reference(x, w1, w2, w3):
    h1 = x @ w1
    h2 = x @ w2
    return (jax.nn.silu(h1) * h2) @ w3


if __name__ == "__main__":
    # ---- test 1: module-consistent small shapes, pre-packed (hoisted) path ----
    # batch=2, seq=8, d_model=48 -> d_ff = int(48 * 8/3) = 128
    batch, seq, d_model = 2, 8, 48
    d_ff = int(d_model * 8 / 3)  # 128

    key = jax.random.PRNGKey(0)
    kx, k1, k2, k3 = jax.random.split(key, 4)
    x = jax.random.normal(kx, (batch, seq, d_model), dtype=jnp.float32)
    bound1 = 1.0 / (d_model ** 0.5)
    bound3 = 1.0 / (d_ff ** 0.5)
    w1 = jax.random.uniform(k1, (d_model, d_ff), jnp.float32, -bound1, bound1)
    w2 = jax.random.uniform(k2, (d_model, d_ff), jnp.float32, -bound1, bound1)
    w3 = jax.random.uniform(k3, (d_ff, d_model), jnp.float32, -bound3, bound3)

    x2d = x.reshape(batch * seq, d_model)
    tm_e, tf_e, vlim = plan_swiglu_tiles(batch * seq, d_model, d_ff, x.dtype, w1.dtype)
    w12, w3p = pack_swiglu_weights(w1, w2, w3, tf_e)       # hoisted: once per weight load
    out2d = swiglu_pallas_packed(x2d, w12, w3p, tm=tm_e, tf=tf_e, vmem_limit=vlim)
    out = out2d.reshape(batch, seq, d_model)
    jax.block_until_ready(out)

    ref = swiglu_reference(x2d, w1, w2, w3).reshape(batch, seq, d_model)
    assert out.shape == (batch, seq, d_model)
    assert jnp.allclose(out, ref, atol=1e-4, rtol=1e-4), "mismatch vs reference"

    # ---- test 2: token tiling, d_ff accumulation & padding (convenience path) ----
    d_model2 = 128
    d_ff2 = int(d_model2 * 8 / 3)   # 341 -> padded to 384 internally
    tokens2 = 256
    kb = jax.random.split(jax.random.PRNGKey(0), 4)
    xb_ = jax.random.normal(kb[0], (tokens2, d_model2), dtype=jnp.float32)
    b1 = 1.0 / (d_model2 ** 0.5)
    b3 = 1.0 / (d_ff2 ** 0.5)
    w1b = jax.random.uniform(kb[1], (d_model2, d_ff2), jnp.float32, -b1, b1)
    w2b = jax.random.uniform(kb[2], (d_model2, d_ff2), jnp.float32, -b1, b1)
    w3b = jax.random.uniform(kb[3], (d_ff2, d_model2), jnp.float32, -b3, b3)

    out_b = swiglu_pallas(xb_, w1b, w2b, w3b, tm=128, tf=128)
    jax.block_until_ready(out_b)
    ref_b = swiglu_reference(xb_, w1b, w2b, w3b)
    assert jnp.allclose(out_b, ref_b, atol=1e-3, rtol=1e-3), "mismatch (tiled path)"

    # ---- test 3: bf16 activations/weights (f32 accumulation inside the kernel) ----
    xc = xb_[:64].astype(jnp.bfloat16)
    w1c, w2c, w3c = (w.astype(jnp.bfloat16) for w in (w1b, w2b, w3b))
    out_c = swiglu_pallas(xc, w1c, w2c, w3c, tm=64, tf=128)
    jax.block_until_ready(out_c)
    ref_c = swiglu_reference(xc.astype(jnp.float32), w1c.astype(jnp.float32),
                             w2c.astype(jnp.float32), w3c.astype(jnp.float32))
    assert jnp.allclose(out_c.astype(jnp.float32), ref_c, atol=3e-2, rtol=3e-2), \
        "mismatch (bf16 path)"

    print("KERNEL_OK")
</pallas_src>

<mosaic_0001>
module attributes {stable_mosaic.version = 11 : i64} {
  func.func @_swiglu_kernel(%arg0: i32, %arg1: i32, %arg2: memref<8x48xf32, #tpu.memory_space<vmem>>, %arg3: memref<1x48x256xf32, #tpu.memory_space<vmem>>, %arg4: memref<128x48xf32, #tpu.memory_space<vmem>>, %arg5: memref<8x48xf32, #tpu.memory_space<vmem>>, %arg6: memref<8x48xf32, #tpu.memory_space<vmem>>) attributes {dimension_semantics = [#tpu.dimension_semantics<parallel>, #tpu.dimension_semantics<arbitrary>], iteration_bounds = array<i64: 2, 1>, scalar_prefetch = 0 : i64, scratch_operands = 1 : i64, tpu.core_type = #tpu.core_type<tc>, window_params = [{transform_indices = @transform_0, window_bounds = array<i64: 8, 48>}, {transform_indices = @transform_1, window_bounds = array<i64: 1, 48, 256>}, {transform_indices = @transform_2, window_bounds = array<i64: 128, 48>}, {transform_indices = @transform_3, window_bounds = array<i64: 8, 48>}]} {
    %c0_i32 = arith.constant 0 : i32
    %0 = arith.cmpi eq, %arg1, %c0_i32 : i32
    %1 = arith.extui %0 : i1 to i32
    %c0_i32_0 = arith.constant 0 : i32
    %2 = arith.cmpi ne, %1, %c0_i32_0 : i32
    scf.if %2 {
      %cst_15 = arith.constant 0.000000e+00 : f32
      %24 = vector.broadcast %cst_15 : f32 to vector<8x48xf32>
      %c0_16 = arith.constant 0 : index
      %c0_17 = arith.constant 0 : index
      %25 = vector.load %arg6[%c0_16, %c0_17] : memref<8x48xf32, #tpu.memory_space<vmem>>, vector<8x48xf32>
      tpu.vector_store %arg6[%c0_16, %c0_17], %24 {strides = array<i32>} : memref<8x48xf32, #tpu.memory_space<vmem>>, vector<8x48xf32>,
    } else {
    }
    %c0 = arith.constant 0 : index
    %c0_1 = arith.constant 0 : index
    %3 = vector.load %arg2[%c0, %c0_1] : memref<8x48xf32, #tpu.memory_space<vmem>>, vector<8x48xf32>
    %c0_2 = arith.constant 0 : index
    %c0_3 = arith.constant 0 : index
    %c0_4 = arith.constant 0 : index
    %4 = vector.load %arg3[%c0_2, %c0_3, %c0_4] : memref<1x48x256xf32, #tpu.memory_space<vmem>>, vector<1x48x256xf32>
    %5 = vector.shape_cast %4 : vector<1x48x256xf32> to vector<48x256xf32>
    %cst = arith.constant dense<0.000000e+00> : vector<8x256xf32>
    %6 = tpu.matmul %3, %5, %cst {dimension_numbers = #tpu.dot_dimension_numbers<[1], [0], [0], [1], [0, 0, 1, 1], [], []>} : vector<8x48xf32>, vector<48x256xf32>, vector<8x256xf32> -> vector<8x256xf32>
    %7 = vector.extract_strided_slice %6 {offsets = [0, 0], sizes = [8, 128], strides = [1, 1]} : vector<8x256xf32> to vector<8x128xf32>
    %8 = vector.extract_strided_slice %6 {offsets = [0, 128], sizes = [8, 128], strides = [1, 1]} : vector<8x256xf32> to vector<8x128xf32>
    %9 = arith.negf %7 : vector<8x128xf32>
    %10 = math.exp %9 : vector<8x128xf32>
    %cst_5 = arith.constant 1.000000e+00 : f32
    %11 = vector.broadcast %cst_5 : f32 to vector<8x128xf32>
    %12 = arith.addf %11, %10 : vector<8x128xf32>
    %13 = arith.divf %11, %12 : vector<8x128xf32>
    %14 = arith.mulf %7, %13 : vector<8x128xf32>
    %15 = arith.mulf %14, %8 : vector<8x128xf32>
    %c0_6 = arith.constant 0 : index
    %c0_7 = arith.constant 0 : index
    %16 = vector.load %arg6[%c0_6, %c0_7] : memref<8x48xf32, #tpu.memory_space<vmem>>, vector<8x48xf32>
    %c0_8 = arith.constant 0 : index
    %c0_9 = arith.constant 0 : index
    %17 = vector.load %arg4[%c0_8, %c0_9] : memref<128x48xf32, #tpu.memory_space<vmem>>, vector<128x48xf32>
    %cst_10 = arith.constant dense<0.000000e+00> : vector<8x48xf32>
    %18 = tpu.matmul %15, %17, %cst_10 {dimension_numbers = #tpu.dot_dimension_numbers<[1], [0], [0], [1], [0, 0, 1, 1], [], []>} : vector<8x128xf32>, vector<128x48xf32>, vector<8x48xf32> -> vector<8x48xf32>
    %19 = arith.addf %16, %18 : vector<8x48xf32>
    %c0_11 = arith.constant 0 : index
    %c0_12 = arith.constant 0 : index
    %20 = vector.load %arg6[%c0_11, %c0_12] : memref<8x48xf32, #tpu.memory_space<vmem>>, vector<8x48xf32>
    tpu.vector_store %arg6[%c0_11, %c0_12], %19 {strides = array<i32>} : memref<8x48xf32, #tpu.memory_space<vmem>>, vector<8x48xf32>,
    %c0_i32_13 = arith.constant 0 : i32
    %21 = arith.cmpi eq, %arg1, %c0_i32_13 : i32
    %22 = arith.extui %21 : i1 to i32
    %c0_i32_14 = arith.constant 0 : i32
    %23 = arith.cmpi ne, %22, %c0_i32_14 : i32
    scf.if %23 {
      %c0_15 = arith.constant 0 : index
      %c0_16 = arith.constant 0 : index
      %24 = vector.load %arg6[%c0_15, %c0_16] : memref<8x48xf32, #tpu.memory_space<vmem>>, vector<8x48xf32>
      %c0_17 = arith.constant 0 : index
      %c0_18 = arith.constant 0 : index
      %25 = vector.load %arg5[%c0_17, %c0_18] : memref<8x48xf32, #tpu.memory_space<vmem>>, vector<8x48xf32>
      tpu.vector_store %arg5[%c0_17, %c0_18], %24 {strides = array<i32>} : memref<8x48xf32, #tpu.memory_space<vmem>>, vector<8x48xf32>,
    } else {
    }
    return
  }
  func.func @transform_0(%arg0: i32, %arg1: i32) -> (i32, i32) {
    %c0_i32 = arith.constant 0 : i32
    %c0_i32_0 = arith.constant 0 : i32
    return %arg0, %c0_i32 : i32, i32
  }
  func.func @transform_1(%arg0: i32, %arg1: i32) -> (i32, i32, i32) {
    %c0_i32 = arith.constant 0 : i32
    %c0_i32_0 = arith.constant 0 : i32
    %c0_i32_1 = arith.constant 0 : i32
    return %arg1, %c0_i32, %c0_i32_0 : i32, i32, i32
  }
  func.func @transform_2(%arg0: i32, %arg1: i32) -> (i32, i32) {
    %c0_i32 = arith.constant 0 : i32
    %c0_i32_0 = arith.constant 0 : i32
    return %arg1, %c0_i32 : i32, i32
  }
  func.func @transform_3(%arg0: i32, %arg1: i32) -> (i32, i32) {
    %c0_i32 = arith.constant 0 : i32
    %c0_i32_0 = arith.constant 0 : i32
    return %arg0, %c0_i32 : i32, i32
  }
}

</mosaic_0001>

<bundles_post_ra>
// kernel: swiglu_pallas_packed.1
= control target key start
LH: loop header
LB: loop body
LE: loop exit
PB: predicated region body
PF: predicated region fallthrough
CT: control target
= control target key end

     0   :  { %8 = vsyncpa [#allocation4], 0  ;;  %s824_s0 = inlined_call_operand.vmem [shape: f32[16,48], index: 0, kind: input, shape index: {}]   ;;  %s825_s1 = inlined_call_operand.vmem [shape: f32[1,48,256], index: 1, kind: input, shape index: {}]   ;;  %s826_s2 = inlined_call_operand.vmem [shape: f32[128,48], index: 2, kind: input, shape index: {}]   ;;  %s827_s3 = inlined_call_operand.hbm [shape: f32[16,48], index: 3, kind: output, shape index: {}]  }
   0x1   :  { %10 = vsyncpa [#allocation4 + $0x1], 0  ;;  %s638_s12 = smov 0   ;;  %s640_s13 = smov 0  }
   0x2   :  { %s642_s14 = smov 0   ;;  %s644_s15 = smov 0  }
   0x3   :  { %s646_s16 = smov 0   ;;  %s648_s17 = smov 0  }
   0x4 LB: > { %s461_s18 = sadd.s32 4294967295, %s615_s17   ;;  %s462_s19 = sadd.s32 4294967294, %s615_s17   ;;  %s615_s17 = sphi %s648_s17, %s16_s17   ;;  %s611_s16 = sphi %s646_s16, %s834_s16   ;;  %s607_s15 = sphi %s644_s15, %s833_s15   ;;  %s603_s14 = sphi %s642_s14, %s832_s14   ;;  %s599_s13 = sphi %s640_s13, %s831_s13   ;;  %s595_s12 = sphi %s638_s12, %s830_s12  }
   0x5   : > { %s28_s20 = sadd.s32 1, %s611_s16  ;;  %s113_s21 = sadd.s32 1, %s603_s14 }
   0x6   : > { %p30_p0 = scmp.ge.s32.totalorder %s28_s20, 2  ;;  %p123_p1 = scmp.ne.s32.totalorder %s603_s14, %s599_s13 }
   0x7   : > { %p124_p2 = scmp.eq.s32.totalorder %s461_s18, 1  ;;  %p129_p3 = scmp.ne.s32.totalorder %s599_s13, %s595_s12 }
   0x8   : > { %s836_s20 = smov (%p30_p0, %s28_s20), 0  ;;  %p130_p5 = scmp.eq.s32.totalorder %s462_s19, 1 }
   0x9   : > { %p678_p4 = por %p124_p2, %p123_p1  ;;  %s110_s23 = ssub.s32 %s611_s16, %s836_s20 }
   0xa   : > { %p467_p6 = scmp.ge.s32.totalorder %s615_s17, 1  ;;  %p111_p7 = scmp.eq.s32.totalorder %s110_s23, 0 }
   0xb   : > { %p685_p8 = por %p130_p5, %p129_p3  ;;  %p172_p9 = scmp.lt.s32.totalorder %s615_s17, 3 }
   0xc   : > { %s691_s25 = scalar_select %p111_p7, %s603_s14, %s113_s21  }
   0xd   : > { %p173_p10 = pnand %p467_p6, %p172_p9 }
   0xe   : > { %p205_p11 = scmp.lt.s32.totalorder (!%p173_p10), %s607_s15, 1  ;;  %s202_s9 = sand.u32 (!%p173_p10), 1, %s599_s13  }
   0xf   : > { %176 = sbr.rel (%p173_p10) target bundleno = 335 (0x14f), region = 32  ;;  %s468_s10 = sshll.u32 (!%p173_p10), %s202_s9, 3 }
  0x10   : > { %s474_s11 = sshll.u32 (!%p173_p10), %s607_s15, 3  ;;  %s204_s23 = scalar_lea.vmem (!%p173_p10), [#allocation3], %s468_s10 }
  0x11   : > { %s359_s21 = scalar_lea.hbm (!%p173_p10), %s827_s3, %s474_s11  ;;  %s361_s26 = sshll.u32 (!%p173_p10), %s204_s23, 4  ;;  %s362_s26 = int_to_ptr.vmem [resolvable:$true] %s361_s26 }
  0x12   : > { %s363_s27 = sshll.u32 (!%p173_p10), %s359_s21, 4  ;;  %s349_s28 = scalar_lea.sflag (!%p173_p10), [#allocation4], %s202_s9  ;;  %s364_s27 = int_to_ptr.hbm [resolvable:$true] %s363_s27 }
  0x14   : > { %v237_v0 = vld [vmem:[%s825_s1 + $0x50] sm:$0xff]  ;;  %v235_v1 = vld [vmem:[%s825_s1 + $0x40] sm:$0xff]  ;;  %s206_s5 = scalar_select %p205_p11, %s607_s15, 1  ;;  %v238_v3 = vld [vmem:[%s825_s1 + $0x58] sm:$0xff]  ;;  %vm224_vm0 = vcmask 392192   ;;  %v617_v31 = vmov 0.0  }
  0x15   : > { %253 = vmatpush.msra.mxu0 %v237_v0  ;;  %v233_v2 = vld [vmem:[%s825_s1 + $0x30] sm:$0xff]  ;;  %v236_v4 = vld [vmem:[%s825_s1 + $0x48] sm:$0xff]  ;;  %273 = vmatpush.msra.mxu1 %v238_v3  ;;  %v231_v5 = vld [vmem:[%s825_s1 + $0x20] sm:$0xff]  ;;  %225 = vst.msk [vmem:[#allocation2] sm:$0xff] %vm224_vm0, %v617_v31 }
  0x16   : > { %s469_s18 = sshll.u32 %s206_s5, 3  ;;  %v234_v6 = vld [vmem:[%s825_s1 + $0x38] sm:$0xff]  ;;  %v229_v7 = vld [vmem:[%s825_s1 + $0x10] sm:$0xff]  ;;  %v232_v8 = vld [vmem:[%s825_s1 + $0x28] sm:$0xff]  ;;  %s557_s5 = scalar_lea.hbm %s827_s3, 16 }
  0x17   : > { %254 = vmatpush.msra.mxu0 %v235_v1  ;;  %274 = vmatpush.msra.mxu1 %v236_v4  ;;  %s208_s29 = scalar_lea.vmem %s824_s0, %s469_s18  ;;  %v227_v9 = vld [vmem:[%s825_s1] sm:$0xff]  ;;  %v230_v10 = vld [vmem:[%s825_s1 + $0x18] sm:$0xff]  ;;  %v228_v12 = vld [vmem:[%s825_s1 + $0x8] sm:$0xff] }
  0x18   : > { %v226_v11 = vld [vmem:[%s208_s29] sm:$0xff]  ;;  %v320_v13 = vld [vmem:[%s826_s2 + $0x78] sm:$0xff]  ;;  %v319_v14 = vld [vmem:[%s826_s2 + $0x70] sm:$0xff]  ;;  %s551_s29 = sshra.s32 %s364_s27, 4  ;;  %s552_s29 = int_to_ptr.hbm [resolvable:$true] %s551_s29 }
  0x19   : > { %255 = vmatpush.msra.mxu0 %v233_v2  ;;  %275 = vmatpush.msra.mxu1 %v234_v6  ;;  %v318_v15 = vld [vmem:[%s826_s2 + $0x68] sm:$0xff]  ;;  %v317_v16 = vld [vmem:[%s826_s2 + $0x60] sm:$0xff]  ;;  %v316_v17 = vld [vmem:[%s826_s2 + $0x58] sm:$0xff]  ;;  %s553_s15 = scalar_lea.hbm %s552_s29, 8  ;;  %p558_p1 = scmp.lt.s32.totalorder %s552_s29, %s827_s3 }
  0x1a   : > { %321 = vmatpush.msra.mxu2 %v320_v13  ;;  %v315_v18 = vld [vmem:[%s826_s2 + $0x50] sm:$0xff]  ;;  %v314_v19 = vld [vmem:[%s826_s2 + $0x48] sm:$0xff]  ;;  %v313_v20 = vld [vmem:[%s826_s2 + $0x40] sm:$0xff]  ;;  %p554_p12 = scmp.ne.s32.totalorder %s552_s29, %s553_s15  ;;  %p559_p2 = scmp.lt.s32.totalorder %s557_s5, %s553_s15 }
  0x1b   : > { %256 = vmatpush.msra.mxu0 %v231_v5  ;;  %276 = vmatpush.msra.mxu1 %v232_v8  ;;  %v312_v21 = vld [vmem:[%s826_s2 + $0x38] sm:$0xff]  ;;  %v311_v22 = vld [vmem:[%s826_s2 + $0x30] sm:$0xff]  ;;  %v310_v23 = vld [vmem:[%s826_s2 + $0x28] sm:$0xff] }
  0x1c   : > { %322 = vmatpush.msra.mxu2 %v319_v14  ;;  %v309_v24 = vld [vmem:[%s826_s2 + $0x20] sm:$0xff]  ;;  %v308_v25 = vld [vmem:[%s826_s2 + $0x18] sm:$0xff]  ;;  %v307_v26 = vld [vmem:[%s826_s2 + $0x10] sm:$0xff]  ;;  %p555_p13 = pnand %p554_p12, %p678_p4  ;;  %p560_p3 = por %p559_p2, %p558_p1 }
  0x1d   : > { %257 = vmatpush.msra.mxu0 %v229_v7  ;;  %277 = vmatpush.msra.mxu1 %v230_v10  ;;  %v306_v27 = vld [vmem:[%s826_s2 + $0x8] sm:$0xff]  ;;  %v305_v28 = vld [vmem:[%s826_s2] sm:$0xff] }
  0x1e   : > { %323 = vmatpush.msra.mxu2 %v318_v15  ;;  %v304_v47 = vld [vmem:[#allocation2] sm:$0xff]  ;;  %p556_p0 = pneg %p555_p13 }
  0x1f   : > { %258 = vmatpush.msra.mxu0 %v227_v9  ;;  %278 = vmatpush.msra.mxu1 %v228_v12 }
  0x20   : > { %470 = vmatmul.msk.f32.vlgmr.msra.gmra.mxu0 %vm224_vm0, %v226_v11  ;;  %471 = vmatmul.msk.f32.vlgmr.msra.gmra.mxu1 %vm224_vm0, %v226_v11  ;;  %p561_p5 = pnand %p560_p3, %p556_p0 }
  0x21   : > { %324 = vmatpush.msra.mxu2 %v317_v16 }
  0x23   : > { %325 = vmatpush.msra.mxu2 %v316_v17 }
  0x25   : > { %326 = vmatpush.msra.mxu2 %v315_v18 }
  0x27   : > { %327 = vmatpush.msra.mxu2 %v314_v19 }
  0x29   : > { %328 = vmatpush.msra.mxu2 %v313_v20 }
  0x2b   : > { %329 = vmatpush.msra.mxu2 %v312_v21 }
  0x2d   : > { %330 = vmatpush.msra.mxu2 %v311_v22 }
  0x2f   : > { %331 = vmatpush.msra.mxu2 %v310_v23 }
  0x31   : > { %332 = vmatpush.msra.mxu2 %v309_v24 }
  0x33   : > { %333 = vmatpush.msra.mxu2 %v308_v25 }
  0x35   : > { %334 = vmatpush.msra.mxu2 %v307_v26 }
  0x37   : > { %335 = vmatpush.msra.mxu2 %v306_v27 }
  0x39   : > { %336 = vmatpush.msra.mxu2 %v305_v28 }
  0x9d   : > { %v260_v29 = vpop.f32.mrf.mxu0  ;;  %v280_v44 = vpop.f32.mrf.mxu1 }
  0x9e   : > { %v472_v30 = vmul.f32 -1.442695, %v260_v29 }
  0xa0   : > { %533 = vpow2.f32 %v472_v30 }
  0xa6   : > { %v534_v32 = vpop.eup %533 }
  0xa7   : > { %v286_v33 = vadd.f32 1.0, %v534_v32 }
  0xa9   : > { %535 = vrcp.f32 %v286_v33  ;;  %v298_v37 = vand.u32 2147483648, %v286_v33  ;;  %v296_v39 = vand.u32 2147483647, %v286_v33  ;;  %vm292_vm2 = vweird.f32 %v286_v33 }
  0xab   : > { %v299_v41 = vor.u32 1.1754944e-38, %v298_v37  ;;  %vm297_vm4 = vcmp.eq.f32.partialorder %v296_v39, 8.507059e+37 }
  0xaf   : > { %v536_v34 = vpop.eup %535 }
  0xb0   : > { %v288_v35 = vmul.f32 %v536_v34, %v286_v33  ;;  %vm293_vm1 = vweird.f32 %v536_v34 }
  0xb1   : > { %vm294_vm3 = vmor %vm292_vm2, %vm293_vm1 }
  0xb2   : > { %v289_v36 = vsub.f32 1.0, %v288_v35 }
  0xb4   : > { %v290_v38 = vmul.f32 %v536_v34, %v289_v36 }
  0xb6   : > { %v291_v40 = vadd.f32 %v536_v34, %v290_v38 }
  0xb8   : > { %v295_v42 = vsel %vm294_vm3, %v536_v34, %v291_v40 }
  0xb9   : > { %v300_v43 = vsel %vm297_vm4, %v299_v41, %v295_v42 }
  0xba   : > { %v302_v45 = vmul.f32 %v300_v43, %v260_v29 }
  0xbc   : > { %v303_v46 = vmul.f32 %v302_v45, %v280_v44 }
  0xbe   : > { %337 = vmatmul.f32.vlgmr.msra.gmra.mxu2 %v303_v46 }
 0x141   : > { %v338_v48 = vpop.f32.mrf.mxu2 }
 0x142   : > { %v341_v49 = vadd.f32 %v338_v48, %v304_v47 }
 0x144   : > { %342 = vst.msk [vmem:[#allocation2] sm:$0xff] %vm224_vm0, %v341_v49 }
 0x14b   : > { %v346_v50 = vld [vmem:[#allocation2] sm:$0xff] }
 0x14c   : > { %347 = vst.msk [vmem:[%s204_s23] sm:$0xff] %vm224_vm0, %v346_v50 }
 0x14d   : > { %564 = shalt.err (!%p561_p5)
}
 0x14e   : > { %477 = dma.vmem_to_hbm [thread:$0]  (%p678_p4), %s362_s26, 128, %s364_s27, %s349_s28  }
 0x14f PF: > { %p483_p6 = scmp.ge.s32.totalorder %s615_s17, 2  ;;  %s375_s8 = sand.u32 1, %s595_s12  }
 0x150   : > { %s376_s9 = scalar_lea.sflag [#allocation4], %s375_s8 }
 0x151   : > { %p480_p7 = pnand %p483_p6, %p685_p8 }
 0x153   : > { %p481_p9 = pneg %p480_p7 }
 0x155   : > { %590 = dma.done.wait (%p481_p9), %s376_s9, 128  }
 0x156   : > { %592 = vsyncadd (%p481_p9), %s376_s9, 4294967168  ;;  %s16_s17 = sadd.s32 1, %s615_s17   ;;  %s830_s12 = smov %s599_s13 }
 0x157   : > { %p13_p10 = scmp.ge.s32.totalorder %s16_s17, 4   ;;  %s831_s13 = smov %s603_s14 }
 0x158   : > { %s832_s14 = smov %s691_s25  ;;  %s833_s15 = smov %s611_s16 }
 0x159   : > { %s834_s16 = smov %s836_s20  ;;  %15 = sbr.rel (!%p13_p10) target bundleno = 4 (0x4), region = 81 }
 0x15e   :  { %382 = vsyncpa [#allocation4], 1 }
 0x15f   :  { %384 = vsyncpa [#allocation4 + $0x1], 1 }

</bundles_post_ra>
